<compile_context>
chip_gen: v7x
topology: tpu7x:2x2x1
jax: 0.10.0
libtpu: 0.0.40
codegen_flags: <defaults>
</compile_context>

<pallas_src>
import jax
import jax.numpy as jnp
from jax.experimental import pallas as pl
from jax.experimental.pallas import tpu as pltpu

_SUBLANE_F32 = 8
_TARGET_STEP_BYTES = 2 * 1024 * 1024     # >= ~2 MiB moved per grid step
_VMEM_TILE_BUDGET = 24 * 1024 * 1024     # tile-sizing budget (fits all gens)
_VMEM_LIMIT_BYTES = 32 * 1024 * 1024     # explicit scoped-VMEM limit


def _round_up(v, m):
    return ((v + m - 1) // m) * m


def _make_gaussian_kernel(z_dim, compute_dtype):
    def kernel(x_ref, w_ref, b_ref, mu_ref, lv_ref):
        x = x_ref[...]
        if compute_dtype is not None:
            # Cast in-kernel (vreg-level) -> no extra HBM pass over x.
            x = x.astype(compute_dtype)
        # One MXU matmul per batch tile: [tile_b, in_dim] @ [in_dim, 2*z_dim].
        acc = jnp.dot(x, w_ref[...], preferred_element_type=jnp.float32)
        acc = acc + b_ref[...]                      # bias add stays f32 (VPU)
        mu_ref[...] = acc[:, :z_dim].astype(mu_ref.dtype)
        lv_ref[...] = acc[:, z_dim:].astype(lv_ref.dtype)
    return kernel


def _choose_tile_b(B, in_dim, n_cat, x_item, out_item, w_item, sublane,
                   user_tile):
    """Batch-tile selection: overhead-amortizing, VMEM-aware, megacore-aware."""
    b_ceil = _round_up(max(B, 1), sublane)
    row_bytes = in_dim * x_item + n_cat * out_item
    if user_tile is not None:
        tile_b = _round_up(max(int(user_tile), sublane), sublane)
    else:
        tile_b = _round_up(pl.cdiv(_TARGET_STEP_BYTES, row_bytes), sublane)
    tile_b = min(tile_b, b_ceil)
    # VMEM cap: double-buffered x / mu / logvar tiles + resident fused weights.
    resident = 2 * in_dim * n_cat * w_item + 2 * n_cat * 4
    max_rows = max(sublane, (_VMEM_TILE_BUDGET - resident) // (2 * row_bytes))
    tile_b = min(tile_b, max(sublane, (max_rows // sublane) * sublane))
    # Keep >= 2 grid steps so both v7x TensorCores get work.
    if b_ceil >= 2 * sublane:
        tile_b = min(tile_b, _round_up(pl.cdiv(b_ceil, 2), sublane))
    # Re-balance tiles so final-tile padding waste stays small.
    n_tiles = pl.cdiv(B, tile_b)
    tile_b = _round_up(pl.cdiv(B, n_tiles), sublane)
    return max(sublane, tile_b)


def gaussian_fuse_params(w_mu, b_mu, w_var, b_var, *, compute_dtype=None):
    """Fuse the two projections once (hoist/cache this out of the hot path).

    w_*: [in_dim, z_dim]  (transpose of PyTorch Linear weight), b_*: [z_dim].
    Returns (w_cat [in_dim, 2*z_dim], b_cat [1, 2*z_dim] f32).
    """
    n_cat = 2 * w_mu.shape[1]
    w_cat = jnp.concatenate([w_mu, w_var], axis=1)
    b_cat = jnp.concatenate([b_mu, b_var], axis=0).astype(jnp.float32)
    b_cat = b_cat.reshape(1, n_cat)
    if compute_dtype is not None:
        # Only the tiny resident weights are cast in the wrapper.
        w_cat = w_cat.astype(compute_dtype)
    return w_cat, b_cat


def gaussian_forward_fused(x, w_cat, b_cat, *, tile_b=None, compute_dtype=None):
    """Forward with pre-fused params. Returns (mu, logvar), each [B, z_dim]."""
    B, in_dim = x.shape
    n_cat = w_cat.shape[1]
    z_dim = n_cat // 2
    out_dtype = x.dtype

    # dtype-aware sublane multiple (8 f32 / 16 bf16 / 32 int8-fp8).
    itemsizes = [jnp.dtype(x.dtype).itemsize, jnp.dtype(out_dtype).itemsize]
    if compute_dtype is not None:
        itemsizes.append(jnp.dtype(compute_dtype).itemsize)
    sublane = max(_SUBLANE_F32, 32 // min(itemsizes))

    tile_b = _choose_tile_b(B, in_dim, n_cat,
                            jnp.dtype(x.dtype).itemsize,
                            jnp.dtype(out_dtype).itemsize,
                            jnp.dtype(w_cat.dtype).itemsize,
                            sublane, tile_b)

    b_pad = _round_up(B, tile_b)
    x_in = jnp.pad(x, ((0, b_pad - B), (0, 0))) if b_pad != B else x
    grid = (b_pad // tile_b,)

    cost = pl.CostEstimate(
        flops=2 * b_pad * in_dim * n_cat,
        transcendentals=0,
        bytes_accessed=(b_pad * in_dim * jnp.dtype(x.dtype).itemsize   # x
                        + in_dim * n_cat * jnp.dtype(w_cat.dtype).itemsize
                        + n_cat * 4                                    # bias
                        + 2 * b_pad * z_dim * jnp.dtype(out_dtype).itemsize),
    )

    mu, logvar = pl.pallas_call(
        _make_gaussian_kernel(z_dim, compute_dtype),
        out_shape=(jax.ShapeDtypeStruct((b_pad, z_dim), out_dtype),
                   jax.ShapeDtypeStruct((b_pad, z_dim), out_dtype)),
        grid=grid,
        in_specs=[
            pl.BlockSpec((tile_b, in_dim), lambda i: (i, 0)),   # x (pipelined)
            pl.BlockSpec((in_dim, n_cat), lambda i: (0, 0)),    # fused W (resident)
            pl.BlockSpec((1, n_cat), lambda i: (0, 0)),         # fused bias (resident)
        ],
        out_specs=(pl.BlockSpec((tile_b, z_dim), lambda i: (i, 0)),
                   pl.BlockSpec((tile_b, z_dim), lambda i: (i, 0))),
        compiler_params=pltpu.CompilerParams(
            dimension_semantics=("parallel",),
            vmem_limit_bytes=_VMEM_LIMIT_BYTES),
        cost_estimate=cost,
    )(x_in, w_cat, b_cat)

    if b_pad != B:
        mu = mu[:B]
        logvar = logvar[:B]
    return mu, logvar


def gaussian_forward(x, w_mu, b_mu, w_var, b_var, *, tile_b=None,
                     compute_dtype=None):
    """Pallas TPU forward for `Gaussian`.

    x: [B, in_dim]; w_*: [in_dim, z_dim]; b_*: [z_dim].
    Returns (mu, logvar), each [B, z_dim] in x.dtype.
    """
    w_cat, b_cat = gaussian_fuse_params(w_mu, b_mu, w_var, b_var,
                                        compute_dtype=compute_dtype)
    return gaussian_forward_fused(x, w_cat, b_cat, tile_b=tile_b,
                                  compute_dtype=compute_dtype)


if __name__ == "__main__":
    # Small shapes consistent with Linear(in_dim, z_dim) x2.
    B, in_dim, z_dim = 8, 32, 16

    key = jax.random.PRNGKey(0)
    kx, kwm, kbm, kwv, kbv = jax.random.split(key, 5)

    # Deterministic synthetic parameters (PyTorch-style uniform(-bound, bound)).
    bound = 1.0 / jnp.sqrt(in_dim)
    x = jax.random.normal(kx, (B, in_dim), dtype=jnp.float32)
    w_mu = jax.random.uniform(kwm, (in_dim, z_dim), jnp.float32, -bound, bound)
    b_mu = jax.random.uniform(kbm, (z_dim,), jnp.float32, -bound, bound)
    w_var = jax.random.uniform(kwv, (in_dim, z_dim), jnp.float32, -bound, bound)
    b_var = jax.random.uniform(kbv, (z_dim,), jnp.float32, -bound, bound)

    mu, logvar = gaussian_forward(x, w_mu, b_mu, w_var, b_var)
    jax.block_until_ready((mu, logvar))

    # Reference check against plain JAX.
    mu_ref = x @ w_mu + b_mu
    lv_ref = x @ w_var + b_var
    assert mu.shape == (B, z_dim) and logvar.shape == (B, z_dim)
    assert jnp.allclose(mu, mu_ref, atol=1e-5), "mu mismatch"
    assert jnp.allclose(logvar, lv_ref, atol=1e-5), "logvar mismatch"

    print("KERNEL_OK")
</pallas_src>

<mosaic_0001>
module attributes {stable_mosaic.version = 11 : i64} {
  func.func @kernel(%arg0: i32, %arg1: memref<8x32xf32, #tpu.memory_space<vmem>>, %arg2: memref<32x32xf32, #tpu.memory_space<vmem>>, %arg3: memref<1x32xf32, #tpu.memory_space<vmem>>, %arg4: memref<8x16xf32, #tpu.memory_space<vmem>>, %arg5: memref<8x16xf32, #tpu.memory_space<vmem>>) attributes {dimension_semantics = [#tpu.dimension_semantics<parallel>], iteration_bounds = array<i64: 1>, scalar_prefetch = 0 : i64, scratch_operands = 0 : i64, tpu.core_type = #tpu.core_type<tc>, window_params = [{transform_indices = @transform_0, window_bounds = array<i64: 8, 32>}, {pipeline_mode = #tpu.pipeline_mode<synchronous>, transform_indices = @transform_1, window_bounds = array<i64: 32, 32>}, {pipeline_mode = #tpu.pipeline_mode<synchronous>, transform_indices = @transform_2, window_bounds = array<i64: 1, 32>}, {transform_indices = @transform_3, window_bounds = array<i64: 8, 16>}, {transform_indices = @transform_4, window_bounds = array<i64: 8, 16>}]} {
    %c0 = arith.constant 0 : index
    %c0_0 = arith.constant 0 : index
    %0 = vector.load %arg1[%c0, %c0_0] : memref<8x32xf32, #tpu.memory_space<vmem>>, vector<8x32xf32>
    %c0_1 = arith.constant 0 : index
    %c0_2 = arith.constant 0 : index
    %1 = vector.load %arg2[%c0_1, %c0_2] : memref<32x32xf32, #tpu.memory_space<vmem>>, vector<32x32xf32>
    %cst = arith.constant dense<0.000000e+00> : vector<8x32xf32>
    %2 = tpu.matmul %0, %1, %cst {dimension_numbers = #tpu.dot_dimension_numbers<[1], [0], [0], [1], [0, 0, 1, 1], [], []>} : vector<8x32xf32>, vector<32x32xf32>, vector<8x32xf32> -> vector<8x32xf32>
    %c0_3 = arith.constant 0 : index
    %c0_4 = arith.constant 0 : index
    %3 = vector.load %arg3[%c0_3, %c0_4] : memref<1x32xf32, #tpu.memory_space<vmem>>, vector<1x32xf32>
    %4 = vector.broadcast %3 : vector<1x32xf32> to vector<8x32xf32>
    %5 = arith.addf %2, %4 : vector<8x32xf32>
    %6 = vector.extract_strided_slice %5 {offsets = [0, 0], sizes = [8, 16], strides = [1, 1]} : vector<8x32xf32> to vector<8x16xf32>
    %c0_5 = arith.constant 0 : index
    %c0_6 = arith.constant 0 : index
    %7 = vector.load %arg4[%c0_5, %c0_6] : memref<8x16xf32, #tpu.memory_space<vmem>>, vector<8x16xf32>
    tpu.vector_store %arg4[%c0_5, %c0_6], %6 {strides = array<i32>} : memref<8x16xf32, #tpu.memory_space<vmem>>, vector<8x16xf32>,
    %8 = vector.extract_strided_slice %5 {offsets = [0, 16], sizes = [8, 16], strides = [1, 1]} : vector<8x32xf32> to vector<8x16xf32>
    %c0_7 = arith.constant 0 : index
    %c0_8 = arith.constant 0 : index
    %9 = vector.load %arg5[%c0_7, %c0_8] : memref<8x16xf32, #tpu.memory_space<vmem>>, vector<8x16xf32>
    tpu.vector_store %arg5[%c0_7, %c0_8], %8 {strides = array<i32>} : memref<8x16xf32, #tpu.memory_space<vmem>>, vector<8x16xf32>,
    return
  }
  func.func @transform_0(%arg0: i32) -> (i32, i32) {
    %c0_i32 = arith.constant 0 : i32
    %c0_i32_0 = arith.constant 0 : i32
    return %arg0, %c0_i32 : i32, i32
  }
  func.func @transform_1(%arg0: i32) -> (i32, i32) {
    %c0_i32 = arith.constant 0 : i32
    %c0_i32_0 = arith.constant 0 : i32
    %c0_i32_1 = arith.constant 0 : i32
    return %c0_i32, %c0_i32_0 : i32, i32
  }
  func.func @transform_2(%arg0: i32) -> (i32, i32) {
    %c0_i32 = arith.constant 0 : i32
    %c0_i32_0 = arith.constant 0 : i32
    %c0_i32_1 = arith.constant 0 : i32
    return %c0_i32, %c0_i32_0 : i32, i32
  }
  func.func @transform_3(%arg0: i32) -> (i32, i32) {
    %c0_i32 = arith.constant 0 : i32
    %c0_i32_0 = arith.constant 0 : i32
    return %arg0, %c0_i32 : i32, i32
  }
  func.func @transform_4(%arg0: i32) -> (i32, i32) {
    %c0_i32 = arith.constant 0 : i32
    %c0_i32_0 = arith.constant 0 : i32
    return %arg0, %c0_i32 : i32, i32
  }
}

</mosaic_0001>

<bundles_post_ra>
// kernel: tpu_custom_call.1
= control target key start
LH: loop header
LB: loop body
LE: loop exit
PB: predicated region body
PF: predicated region fallthrough
CT: control target
= control target key end

     0   :  { %10 = vsyncpa [#allocation3], 0  ;;  %s392_s0 = inlined_call_operand.hbm [shape: f32[8,32], index: 0, kind: input, shape index: {}]   ;;  %s393_s1 = inlined_call_operand.hbm [shape: f32[32,32], index: 1, kind: input, shape index: {}]   ;;  %s394_s2 = inlined_call_operand.vmem [shape: f32[1,32], index: 2, kind: input, shape index: {}]   ;;  %s395_s3 = inlined_call_operand.hbm [shape: f32[8,16], index: 3, kind: output, shape index: {0}]   ;;  %s396_s4 = inlined_call_operand.hbm [shape: f32[8,16], index: 4, kind: output, shape index: {1}]  }
   0x1   :  { %11 = vsyncpa [#allocation6], 0 }
   0x2   :  { %12 = vsyncpa [#allocation4], 0 }
   0x3   :  { %13 = vsyncpa [#allocation9], 0  ;;  %s297_s15 = smov [#allocation2]   ;;  %s298_s17 = smov [#allocation5]  }
   0x4   :  { %s20_s16 = sshll.u32 %s297_s15, 4  ;;  %s29_s18 = sshll.u32 %s298_s17, 4  ;;  %s21_s16 = int_to_ptr.vmem [resolvable:$true] %s20_s16  ;;  %s332_s18 = int_to_ptr.vmem [resolvable:$true] %s29_s18 }
   0x5   :  { %s201_s21 = scalar_lea.hbm %s392_s0, 128 }
   0x6   :  { %p202_p0 = scmp.ne.s32.totalorder %s392_s0, %s201_s21  ;;  %p205_p1 = scmp.lt.u32.totalorder %s201_s21, %s392_s0 }
   0x8   :  { %p207_p2 = pnand %p205_p1, %p202_p0 }
   0xa   :  { %210 = shalt.err (!%p207_p2)
}
   0xb   :  { %s211_s26 = scalar_lea.vmem %s21_s16, 128  ;;  %p216_p4 = scmp.lt.s32.totalorder %s21_s16, %s21_s16 }
   0xc   :  { %p212_p3 = scmp.ne.s32.totalorder %s21_s16, %s211_s26  ;;  %p217_p5 = scmp.lt.s32.totalorder %s211_s26, %s211_s26 }
   0xe   :  { %p218_p6 = por %p217_p5, %p216_p4 }
  0x10   :  { %p219_p7 = pnand %p218_p6, %p212_p3 }
  0x12   :  { %222 = shalt.err (!%p219_p7)
}
  0x13   :  { %23 = dma.hbm_to_vmem [thread:$0]  %s392_s0, 128, %s21_s16, [#allocation3]  }
  0x14   :  { %s223_s5 = scalar_lea.hbm %s393_s1, 512 }
  0x15   :  { %p224_p8 = scmp.ne.s32.totalorder %s393_s1, %s223_s5  ;;  %p227_p9 = scmp.lt.u32.totalorder %s223_s5, %s393_s1 }
  0x17   :  { %p229_p10 = pnand %p227_p9, %p224_p8 }
  0x19   :  { %232 = shalt.err (!%p229_p10)
}
  0x1a   :  { %s233_s10 = scalar_lea.vmem %s332_s18, 512  ;;  %p238_p12 = scmp.lt.s32.totalorder %s332_s18, %s332_s18 }
  0x1b   :  { %p234_p11 = scmp.ne.s32.totalorder %s332_s18, %s233_s10  ;;  %p239_p13 = scmp.lt.s32.totalorder %s233_s10, %s233_s10 }
  0x1d   :  { %p240_p0 = por %p239_p13, %p238_p12 }
  0x1f   :  { %p241_p1 = pnand %p240_p0, %p234_p11 }
  0x21   :  { %244 = shalt.err (!%p241_p1)
}
  0x22   :  { %s299_s0 = smov 128   ;;  %s300_s11 = smov 8  }
  0x23   :  { %35 = dma.hbm_to_vmem [thread:$0]  %s393_s1, 512, %s332_s18, [#allocation6], %s299_s0, %s299_s0, %s300_s11  }
  0x24   :  { %289 = dma.done.wait [#allocation3], 128  }
  0x25   :  { %290 = vsyncadd [#allocation3], 4294967168 }
  0x26   :  { %291 = dma.done.wait [#allocation6], 512  }
  0x27   :  { %292 = vsyncadd [#allocation6], 4294966784  ;;  %v301_v0 = vmov 0.0|0.0   ;;  %vm302_vm0 = vmmov 0   ;;  %v303_v1 = vmov 0.0   ;;  %v45_v2 = vld [vmem:[#allocation5] sm:$0xff] }
  0x28   :  { %185 = vmatprep.subr.bf16.mxu0 %v301_v0  ;;  %182 = vmatprep.mubr.msk.f32.mxu0 %vm302_vm0, %v303_v1  ;;  %v46_v3 = vld [vmem:[#allocation5 + $0x8] sm:$0xff]  ;;  %v47_v4 = vld [vmem:[#allocation5 + $0x10] sm:$0xff]  ;;  %v48_v6 = vld [vmem:[#allocation5 + $0x18] sm:$0xff]  ;;  %vm56_vm1 = vcmask 261120   ;;  %s304_s15 = smov [#allocation7]   ;;  %vm130_vm2 = vcmask 130048  }
  0x29   :  { %v186_v5 = vpack.c.bf16 %v46_v3, %v45_v2  ;;  %v189_v7 = vpack.c.bf16 %v48_v6, %v47_v4  ;;  %v44_v8 = vld [vmem:[#allocation2] sm:$0xff]  ;;  %s143_s16 = sshll.u32 %s304_s15, 4  ;;  %s305_s17 = smov 112   ;;  %s144_s16 = int_to_ptr.vmem [resolvable:$true] %s143_s16 }
  0x2a   :  { %v167_v9 = vld [vmem:[%s394_s2] ss:$0 sm:$0xff]  ;;  %s245_s18 = scalar_lea.vmem %s144_s16, 128  ;;  %p250_p3 = scmp.lt.s32.totalorder %s144_s16, %s144_s16 }
  0x2b   :  { %187 = vmatpush3.bf16.msra.mxu0 %v186_v5  ;;  %p246_p2 = scmp.ne.s32.totalorder %s144_s16, %s245_s18  ;;  %p251_p4 = scmp.lt.s32.totalorder %s245_s18, %s245_s18 }
  0x2c   :  { %188 = vmatprep.subr.bf16.mxu0 %v301_v0 }
  0x2d   :  { %p252_p5 = por %p251_p4, %p250_p3 }
  0x2f   :  { %190 = vmatpush3.bf16.msra.mxu0 %v189_v7  ;;  %p253_p6 = pnand %p252_p5, %p246_p2 }
  0x32   :  { %183 = vmatmul.mubr.msk.f32.vlgmr.msra.gmra.mrb[0].mxu0 %vm56_vm1, %v44_v8 }
 0x105   :  { %v126_v10 = vpop.f32.mrb[0].mxu0 }
 0x106   :  { %v127_v11 = vadd.f32 %v167_v9, %v126_v10  ;;  %v184_v12 = vpop.f32.mrb[1].mxu0 }
 0x108   :  { %133 = vrot.lane.b32.xlu0 %v127_v11, %s305_s17  ;;  %131 = vst.msk [vmem:[#allocation7] sm:$0xff] %vm130_vm2, %v127_v11 }
 0x109   :  { %256 = shalt.err (!%p253_p6)
}
 0x10a   :  { %s257_s20 = scalar_lea.hbm %s395_s3, 128 }
 0x10b   :  { %p258_p7 = scmp.ne.s32.totalorder %s395_s3, %s257_s20  ;;  %p261_p8 = scmp.lt.u32.totalorder %s257_s20, %s395_s3 }
 0x10d   :  { %p263_p9 = pnand %p261_p8, %p258_p7 }
 0x10f   :  { %266 = shalt.err (!%p263_p9)
}
 0x110   :  { %146 = dma.vmem_to_hbm [thread:$0]  %s144_s16, 128, %s395_s3, [#allocation4]  }
 0x111   :  { %s306_s27 = smov [#allocation8]  }
 0x112   :  { %s153_s28 = sshll.u32 %s306_s27, 4  ;;  %s154_s28 = int_to_ptr.vmem [resolvable:$true] %s153_s28 }
 0x113   :  { %s267_s29 = scalar_lea.vmem %s154_s28, 128  ;;  %p272_p11 = scmp.lt.s32.totalorder %s154_s28, %s154_s28 }
 0x114   :  { %p268_p10 = scmp.ne.s32.totalorder %s154_s28, %s267_s29  ;;  %p273_p12 = scmp.lt.s32.totalorder %s267_s29, %s267_s29 }
 0x116   :  { %p274_p13 = por %p273_p12, %p272_p11 }
 0x118   :  { %p275_p0 = pnand %p274_p13, %p268_p10 }
 0x17a   :  { %v134_v13 = vpop.permute.xlu0 %133 }
 0x17b   :  { %136 = vst.msk [vmem:[#allocation8] sm:$0xff] %vm130_vm2, %v134_v13 }
 0x17c   :  { %278 = shalt.err (!%p275_p0)
}
 0x17d   :  { %s279_s6 = scalar_lea.hbm %s396_s4, 128 }
 0x17e   :  { %p280_p1 = scmp.ne.s32.totalorder %s396_s4, %s279_s6  ;;  %p283_p2 = scmp.lt.u32.totalorder %s279_s6, %s396_s4 }
 0x180   :  { %p285_p3 = pnand %p283_p2, %p280_p1 }
 0x182   :  { %288 = shalt.err (!%p285_p3)
}
 0x183   :  { %156 = dma.vmem_to_hbm [thread:$0]  %s154_s28, 128, %s396_s4, [#allocation9]  }
 0x184   :  { %293 = dma.done.wait [#allocation4], 128  }
 0x185   :  { %294 = vsyncadd [#allocation4], 4294967168 }
 0x186   :  { %295 = dma.done.wait [#allocation9], 128  }
 0x187   :  { %296 = vsyncadd [#allocation9], 4294967168 }
 0x188   :  { %163 = vsyncpa [#allocation3], 1 }
 0x189   :  { %164 = vsyncpa [#allocation6], 1 }
 0x18a   :  { %165 = vsyncpa [#allocation4], 1 }
 0x18b   :  { %166 = vsyncpa [#allocation9], 1 }

</bundles_post_ra>
